<compile_context>
chip_gen: v5e
topology: v5e:2x2
jax: 0.10.0
libtpu: 0.0.40
codegen_flags: <defaults>
</compile_context>

<pallas_src>
import functools

import jax
import jax.numpy as jnp
from jax import lax
from jax.experimental import pallas as pl
from jax.experimental.pallas import tpu as pltpu


def basic_block_kernel(x_ref, wb1_ref, wb2_ref, g1_ref, b1_ref, g2_ref, b2_ref,
                       selp_ref, out_ref, shift_ref, *, H, eps):
    R, L = x_ref.shape                     # (B*H, W*C) lane-dense activations

    # Row-boundary masks (i = r % H): zero the +/-1 row taps at the top/bottom
    # rows of each image (this also covers rows that would wrap into the
    # neighbouring batch image).  Only the H axis needs masking — the W-axis
    # zero padding is built into the banded weights.
    row_i = lax.broadcasted_iota(jnp.int32, (R, 1), 0) % H
    mask_up = row_i >= 1                   # tap at row i-1 is valid
    mask_dn = row_i <= H - 2               # tap at row i+1 is valid

    # Zero only the 1-row halo of the shift scratch (rows 1..R are always
    # fully overwritten before being read).
    shift_ref[0:1, :] = jnp.zeros((1, L), shift_ref.dtype)
    shift_ref[R + 1:R + 2, :] = jnp.zeros((1, L), shift_ref.dtype)

    def conv3x3(v, wband_ref):
        # Stage rows once so the +/-1 row taps are plain sublane-offset loads.
        shift_ref[1:R + 1, :] = v
        up = jnp.where(mask_up, shift_ref[0:R, :], 0.0)        # rows i-1
        dn = jnp.where(mask_dn, shift_ref[2:R + 2, :], 0.0)    # rows i+1
        col = jnp.concatenate([up, v, dn], axis=1)             # (R, 3*W*C)
        return jnp.dot(col.astype(jnp.bfloat16), wband_ref[...],
                       preferred_element_type=jnp.float32)     # (R, W*C) f32

    selp = selp_ref[...]                   # (L, L) same-channel projection / W

    def bn(acc, gamma_l, beta_l):
        # Training-mode BN, one pass: per-channel mean and E[x^2], already
        # broadcast back to every lane by the channel-projection matmul.
        mean_l = jnp.mean(jnp.dot(acc, selp, preferred_element_type=jnp.float32),
                          axis=0, keepdims=True)
        ex2_l = jnp.mean(jnp.dot(acc * acc, selp,
                                 preferred_element_type=jnp.float32),
                         axis=0, keepdims=True)
        var_l = ex2_l - mean_l * mean_l
        scale_l = gamma_l * lax.rsqrt(var_l + eps)
        return acc * scale_l + (beta_l - mean_l * scale_l)

    x = x_ref[...]                                             # f32 identity
    y1 = jnp.maximum(bn(conv3x3(x, wb1_ref), g1_ref[...], b1_ref[...]), 0.0)
    y2 = bn(conv3x3(y1, wb2_ref), g2_ref[...], b2_ref[...]) + x
    out_ref[...] = jnp.maximum(y2, 0.0).astype(out_ref.dtype)


def _banded_conv_weight(w_oihw, W):
    """(Cout, Cin, 3, 3) torch weight -> (3*W*Cin, W*Cout) banded bf16 matrix.

    In the lane-dense (B*H, W*Cin) layout a 3x3 / stride-1 / pad-1 conv is
        out = concat([rows-1, rows, rows+1], lanes) @ Wband
    where each of the three (W*Cin, W*Cout) blocks is block-tridiagonal over
    W; the missing corner blocks implement the W-boundary zero padding.
    """
    w_hwio = jnp.transpose(w_oihw, (2, 3, 1, 0)).astype(jnp.float32)  # (3,3,Ci,Co)
    blocks = []
    for ky in range(3):
        blk = sum(jnp.kron(jnp.eye(W, k=1 - kx, dtype=jnp.float32), w_hwio[ky, kx])
                  for kx in range(3))
        blocks.append(blk)
    return jnp.concatenate(blocks, axis=0).astype(jnp.bfloat16)


def basic_block(x_nchw, w1, g1, b1, w2, g2, b2, *, eps=1e-5):
    """Fused BasicBlock forward.  x: (B,C,H,W); w1,w2: (C,C,3,3) torch layout."""
    B, C, H, W = x_nchw.shape
    assert w1.shape[0] == C, "stride=1 BasicBlock requires inplanes == planes"
    R, L = B * H, W * C

    # NCHW -> lane-dense (B*H, W*C).
    # TODO(synk): accept NHWC directly at production sizes to avoid this extra
    # HBM round-trip before the kernel.
    x_dense = jnp.transpose(x_nchw, (0, 2, 3, 1)).reshape(R, L).astype(jnp.float32)

    wb1 = _banded_conv_weight(w1, W)
    wb2 = _banded_conv_weight(w2, W)

    # Same-channel projection (lane l holds channel l % C): one matmul both
    # reduces to per-channel stats and broadcasts them back to every lane.
    ch = jnp.arange(L, dtype=jnp.int32) % C
    selp = (ch[:, None] == ch[None, :]).astype(jnp.float32) / float(W)

    def lanes(p):  # broadcast a per-channel vector to the lane layout
        return jnp.tile(p.astype(jnp.float32), W).reshape(1, L)

    args = (x_dense, wb1, wb2, lanes(g1), lanes(b1), lanes(g2), lanes(b2), selp)

    out_dense = pl.pallas_call(
        functools.partial(basic_block_kernel, H=H, eps=eps),
        out_shape=jax.ShapeDtypeStruct((R, L), jnp.float32),
        in_specs=[pl.BlockSpec(memory_space=pltpu.MemorySpace.VMEM)] * len(args),
        out_specs=pl.BlockSpec(memory_space=pltpu.MemorySpace.VMEM),
        scratch_shapes=[pltpu.VMEM((R + 2, L), jnp.float32)],
    )(*args)

    return jnp.transpose(out_dense.reshape(B, H, W, C), (0, 3, 1, 2))


def basic_block_reference(x_nchw, w1, g1, b1, w2, g2, b2, eps=1e-5):
    """Pure-JAX reference.  Convs use the same bf16-operand / f32-accumulate
    precision as the kernel's MXU path; BN, residual and ReLU in f32."""
    x = jnp.transpose(x_nchw, (0, 2, 3, 1)).astype(jnp.float32)
    w1_h = jnp.transpose(w1, (2, 3, 1, 0))
    w2_h = jnp.transpose(w2, (2, 3, 1, 0))
    dn = lax.conv_dimension_numbers(x.shape, w1_h.shape, ("NHWC", "HWIO", "NHWC"))

    def conv(t, w):
        return lax.conv_general_dilated(
            t.astype(jnp.bfloat16), w.astype(jnp.bfloat16), (1, 1),
            ((1, 1), (1, 1)), dimension_numbers=dn,
            preferred_element_type=jnp.float32)

    def bn(t, g, b):
        m = jnp.mean(t, axis=(0, 1, 2), keepdims=True)
        v = jnp.mean((t - m) ** 2, axis=(0, 1, 2), keepdims=True)
        return ((t - m) * lax.rsqrt(v + eps) * g.reshape(1, 1, 1, -1)
                + b.reshape(1, 1, 1, -1))

    out = jnp.maximum(bn(conv(x, w1_h), g1, b1), 0.0)
    out = jnp.maximum(bn(conv(out, w2_h), g2, b2) + x, 0.0)
    return jnp.transpose(out, (0, 3, 1, 2))


if __name__ == "__main__":
    # BasicBlock(inplanes=8, planes=8, stride=1); W*C = 128 -> fully lane-dense.
    B, C, H, W = 2, 8, 16, 16
    key = jax.random.PRNGKey(0)
    kx, kw1, kw2 = jax.random.split(key, 3)

    x = jax.random.normal(kx, (B, C, H, W), dtype=jnp.float32)
    w1 = jax.random.normal(kw1, (C, C, 3, 3), dtype=jnp.float32) * 0.1
    w2 = jax.random.normal(kw2, (C, C, 3, 3), dtype=jnp.float32) * 0.1
    g1 = jnp.ones((C,), jnp.float32)   # BatchNorm2d default init
    b1 = jnp.zeros((C,), jnp.float32)
    g2 = jnp.ones((C,), jnp.float32)
    b2 = jnp.zeros((C,), jnp.float32)

    out = jax.block_until_ready(basic_block(x, w1, g1, b1, w2, g2, b2))
    ref = basic_block_reference(x, w1, g1, b1, w2, g2, b2)

    assert out.shape == (B, C, H, W)
    err = float(jnp.max(jnp.abs(out - ref)))
    assert jnp.allclose(out, ref, atol=5e-3, rtol=5e-3), f"max abs err {err}"
    print("KERNEL_OK")
</pallas_src>

<mosaic_0001>
module attributes {stable_mosaic.version = 11 : i64} {
  func.func @basic_block_kernel(%arg0: memref<32x128xf32, #tpu.memory_space<vmem>>, %arg1: memref<384x128xbf16, #tpu.memory_space<vmem>>, %arg2: memref<384x128xbf16, #tpu.memory_space<vmem>>, %arg3: memref<1x128xf32, #tpu.memory_space<vmem>>, %arg4: memref<1x128xf32, #tpu.memory_space<vmem>>, %arg5: memref<1x128xf32, #tpu.memory_space<vmem>>, %arg6: memref<1x128xf32, #tpu.memory_space<vmem>>, %arg7: memref<128x128xf32, #tpu.memory_space<vmem>>, %arg8: memref<32x128xf32, #tpu.memory_space<vmem>>, %arg9: memref<34x128xf32, #tpu.memory_space<vmem>>) attributes {dimension_semantics = [], scalar_prefetch = 0 : i64, scratch_operands = 1 : i64, tpu.core_type = #tpu.core_type<tc>} {
    %0 = tpu.iota {dimensions = array<i32: 0>} : vector<32x1xi32>
    %c16_i32 = arith.constant 16 : i32
    %c0_i32 = arith.constant 0 : i32
    %1 = arith.cmpi eq, %c16_i32, %c0_i32 : i32
    %c1_i32 = arith.constant 1 : i32
    %2 = arith.select %1, %c1_i32, %c16_i32 : i32
    %3 = vector.broadcast %2 : i32 to vector<32x1xi32>
    %4 = arith.remsi %0, %3 : vector<32x1xi32>
    %c0_i32_0 = arith.constant 0 : i32
    %5 = vector.broadcast %c0_i32_0 : i32 to vector<32x1xi32>
    %6 = arith.cmpi ne, %4, %5 : vector<32x1xi32>
    %c0_i32_1 = arith.constant 0 : i32
    %7 = vector.broadcast %c0_i32_1 : i32 to vector<32x1xi32>
    %8 = arith.cmpi slt, %4, %7 : vector<32x1xi32>
    %c0_i32_2 = arith.constant 0 : i32
    %9 = arith.cmpi slt, %2, %c0_i32_2 : i32
    %10 = vector.broadcast %9 : i1 to vector<32x1xi1>
    %11 = vector.broadcast %10 : vector<32x1xi1> to vector<32x1xi1>
    %12 = arith.xori %8, %11 : vector<32x1xi1>
    %13 = arith.andi %12, %6 : vector<32x1xi1>
    %14 = vector.broadcast %2 : i32 to vector<32x1xi32>
    %15 = arith.addi %4, %14 : vector<32x1xi32>
    %16 = arith.select %13, %15, %4 : vector<32x1xi1>, vector<32x1xi32>
    %c1_i32_3 = arith.constant 1 : i32
    %17 = vector.broadcast %c1_i32_3 : i32 to vector<32x1xi32>
    %18 = arith.cmpi sge, %16, %17 : vector<32x1xi32>
    %c14_i32 = arith.constant 14 : i32
    %19 = vector.broadcast %c14_i32 : i32 to vector<32x1xi32>
    %20 = arith.cmpi sle, %16, %19 : vector<32x1xi32>
    %cst = arith.constant 0.000000e+00 : f32
    %21 = vector.broadcast %cst : f32 to vector<1x128xf32>
    %c0 = arith.constant 0 : index
    %c0_4 = arith.constant 0 : index
    %22 = vector.load %arg9[%c0, %c0_4] : memref<34x128xf32, #tpu.memory_space<vmem>>, vector<1x128xf32>
    tpu.vector_store %arg9[%c0, %c0_4], %21 {strides = array<i32>} : memref<34x128xf32, #tpu.memory_space<vmem>>, vector<1x128xf32>,
    %cst_5 = arith.constant 0.000000e+00 : f32
    %23 = vector.broadcast %cst_5 : f32 to vector<1x128xf32>
    %c33 = arith.constant 33 : index
    %c0_6 = arith.constant 0 : index
    %24 = vector.load %arg9[%c33, %c0_6] : memref<34x128xf32, #tpu.memory_space<vmem>>, vector<1x128xf32>
    tpu.vector_store %arg9[%c33, %c0_6], %23 {strides = array<i32>} : memref<34x128xf32, #tpu.memory_space<vmem>>, vector<1x128xf32>,
    %c0_7 = arith.constant 0 : index
    %c0_8 = arith.constant 0 : index
    %25 = vector.load %arg7[%c0_7, %c0_8] : memref<128x128xf32, #tpu.memory_space<vmem>>, vector<128x128xf32>
    %c0_9 = arith.constant 0 : index
    %c0_10 = arith.constant 0 : index
    %26 = vector.load %arg0[%c0_9, %c0_10] : memref<32x128xf32, #tpu.memory_space<vmem>>, vector<32x128xf32>
    %c1 = arith.constant 1 : index
    %c0_11 = arith.constant 0 : index
    %27 = vector.load %arg9[%c1, %c0_11] : memref<34x128xf32, #tpu.memory_space<vmem>>, vector<32x128xf32>
    tpu.vector_store %arg9[%c1, %c0_11], %26 {strides = array<i32>} : memref<34x128xf32, #tpu.memory_space<vmem>>, vector<32x128xf32>,
    %c0_12 = arith.constant 0 : index
    %c0_13 = arith.constant 0 : index
    %28 = vector.load %arg9[%c0_12, %c0_13] : memref<34x128xf32, #tpu.memory_space<vmem>>, vector<32x128xf32>
    %cst_14 = arith.constant 0.000000e+00 : f32
    %29 = vector.shape_cast %18 : vector<32x1xi1> to vector<32x1xi1>
    %30 = vector.broadcast %29 : vector<32x1xi1> to vector<32x128xi1>
    %31 = vector.broadcast %cst_14 : f32 to vector<32x128xf32>
    %32 = arith.select %30, %28, %31 : vector<32x128xi1>, vector<32x128xf32>
    %c2 = arith.constant 2 : index
    %c0_15 = arith.constant 0 : index
    %33 = vector.load %arg9[%c2, %c0_15] : memref<34x128xf32, #tpu.memory_space<vmem>>, vector<32x128xf32>
    %cst_16 = arith.constant 0.000000e+00 : f32
    %34 = vector.shape_cast %20 : vector<32x1xi1> to vector<32x1xi1>
    %35 = vector.broadcast %34 : vector<32x1xi1> to vector<32x128xi1>
    %36 = vector.broadcast %cst_16 : f32 to vector<32x128xf32>
    %37 = arith.select %35, %33, %36 : vector<32x128xi1>, vector<32x128xf32>
    %38 = tpu.concatenate %32, %26, %37 in 1 : vector<32x128xf32>, vector<32x128xf32>, vector<32x128xf32> -> vector<32x384xf32>
    %39 = arith.truncf %38 : vector<32x384xf32> to vector<32x384xbf16>
    %c0_17 = arith.constant 0 : index
    %c0_18 = arith.constant 0 : index
    %40 = vector.load %arg1[%c0_17, %c0_18] : memref<384x128xbf16, #tpu.memory_space<vmem>>, vector<384x128xbf16>
    %cst_19 = arith.constant dense<0.000000e+00> : vector<32x128xf32>
    %41 = tpu.matmul %39, %40, %cst_19 {dimension_numbers = #tpu.dot_dimension_numbers<[1], [0], [0], [1], [0, 0, 1, 1], [], []>} : vector<32x384xbf16>, vector<384x128xbf16>, vector<32x128xf32> -> vector<32x128xf32>
    %c0_20 = arith.constant 0 : index
    %c0_21 = arith.constant 0 : index
    %42 = vector.load %arg3[%c0_20, %c0_21] : memref<1x128xf32, #tpu.memory_space<vmem>>, vector<1x128xf32>
    %c0_22 = arith.constant 0 : index
    %c0_23 = arith.constant 0 : index
    %43 = vector.load %arg4[%c0_22, %c0_23] : memref<1x128xf32, #tpu.memory_space<vmem>>, vector<1x128xf32>
    %cst_24 = arith.constant dense<0.000000e+00> : vector<32x128xf32>
    %44 = tpu.matmul %41, %25, %cst_24 {dimension_numbers = #tpu.dot_dimension_numbers<[1], [0], [0], [1], [0, 0, 1, 1], [], []>} : vector<32x128xf32>, vector<128x128xf32>, vector<32x128xf32> -> vector<32x128xf32>
    %cst_25 = arith.constant dense<0.000000e+00> : vector<128xf32>
    %45 = vector.multi_reduction <add>, %44, %cst_25 [0] : vector<32x128xf32> to vector<128xf32>
    %46 = vector.shape_cast %45 : vector<128xf32> to vector<1x128xf32>
    %cst_26 = arith.constant 3.200000e+01 : f32
    %47 = vector.broadcast %cst_26 : f32 to vector<1x128xf32>
    %48 = arith.divf %46, %47 : vector<1x128xf32>
    %49 = arith.mulf %41, %41 : vector<32x128xf32>
    %cst_27 = arith.constant dense<0.000000e+00> : vector<32x128xf32>
    %50 = tpu.matmul %49, %25, %cst_27 {dimension_numbers = #tpu.dot_dimension_numbers<[1], [0], [0], [1], [0, 0, 1, 1], [], []>} : vector<32x128xf32>, vector<128x128xf32>, vector<32x128xf32> -> vector<32x128xf32>
    %cst_28 = arith.constant dense<0.000000e+00> : vector<128xf32>
    %51 = vector.multi_reduction <add>, %50, %cst_28 [0] : vector<32x128xf32> to vector<128xf32>
    %52 = vector.shape_cast %51 : vector<128xf32> to vector<1x128xf32>
    %cst_29 = arith.constant 3.200000e+01 : f32
    %53 = vector.broadcast %cst_29 : f32 to vector<1x128xf32>
    %54 = arith.divf %52, %53 : vector<1x128xf32>
    %55 = arith.mulf %48, %48 : vector<1x128xf32>
    %56 = arith.subf %54, %55 : vector<1x128xf32>
    %cst_30 = arith.constant 9.99999974E-6 : f32
    %57 = vector.broadcast %cst_30 : f32 to vector<1x128xf32>
    %58 = arith.addf %56, %57 : vector<1x128xf32>
    %59 = math.rsqrt %58 : vector<1x128xf32>
    %60 = arith.mulf %42, %59 : vector<1x128xf32>
    %61 = vector.broadcast %60 : vector<1x128xf32> to vector<32x128xf32>
    %62 = arith.mulf %41, %61 : vector<32x128xf32>
    %63 = arith.mulf %48, %60 : vector<1x128xf32>
    %64 = arith.subf %43, %63 : vector<1x128xf32>
    %65 = vector.broadcast %64 : vector<1x128xf32> to vector<32x128xf32>
    %66 = arith.addf %62, %65 : vector<32x128xf32>
    %cst_31 = arith.constant 0.000000e+00 : f32
    %67 = vector.broadcast %cst_31 : f32 to vector<32x128xf32>
    %68 = arith.maximumf %66, %67 : vector<32x128xf32>
    %c1_32 = arith.constant 1 : index
    %c0_33 = arith.constant 0 : index
    %69 = vector.load %arg9[%c1_32, %c0_33] : memref<34x128xf32, #tpu.memory_space<vmem>>, vector<32x128xf32>
    tpu.vector_store %arg9[%c1_32, %c0_33], %68 {strides = array<i32>} : memref<34x128xf32, #tpu.memory_space<vmem>>, vector<32x128xf32>,
    %c0_34 = arith.constant 0 : index
    %c0_35 = arith.constant 0 : index
    %70 = vector.load %arg9[%c0_34, %c0_35] : memref<34x128xf32, #tpu.memory_space<vmem>>, vector<32x128xf32>
    %cst_36 = arith.constant 0.000000e+00 : f32
    %71 = vector.shape_cast %18 : vector<32x1xi1> to vector<32x1xi1>
    %72 = vector.broadcast %71 : vector<32x1xi1> to vector<32x128xi1>
    %73 = vector.broadcast %cst_36 : f32 to vector<32x128xf32>
    %74 = arith.select %72, %70, %73 : vector<32x128xi1>, vector<32x128xf32>
    %c2_37 = arith.constant 2 : index
    %c0_38 = arith.constant 0 : index
    %75 = vector.load %arg9[%c2_37, %c0_38] : memref<34x128xf32, #tpu.memory_space<vmem>>, vector<32x128xf32>
    %cst_39 = arith.constant 0.000000e+00 : f32
    %76 = vector.shape_cast %20 : vector<32x1xi1> to vector<32x1xi1>
    %77 = vector.broadcast %76 : vector<32x1xi1> to vector<32x128xi1>
    %78 = vector.broadcast %cst_39 : f32 to vector<32x128xf32>
    %79 = arith.select %77, %75, %78 : vector<32x128xi1>, vector<32x128xf32>
    %80 = tpu.concatenate %74, %68, %79 in 1 : vector<32x128xf32>, vector<32x128xf32>, vector<32x128xf32> -> vector<32x384xf32>
    %81 = arith.truncf %80 : vector<32x384xf32> to vector<32x384xbf16>
    %c0_40 = arith.constant 0 : index
    %c0_41 = arith.constant 0 : index
    %82 = vector.load %arg2[%c0_40, %c0_41] : memref<384x128xbf16, #tpu.memory_space<vmem>>, vector<384x128xbf16>
    %cst_42 = arith.constant dense<0.000000e+00> : vector<32x128xf32>
    %83 = tpu.matmul %81, %82, %cst_42 {dimension_numbers = #tpu.dot_dimension_numbers<[1], [0], [0], [1], [0, 0, 1, 1], [], []>} : vector<32x384xbf16>, vector<384x128xbf16>, vector<32x128xf32> -> vector<32x128xf32>
    %c0_43 = arith.constant 0 : index
    %c0_44 = arith.constant 0 : index
    %84 = vector.load %arg5[%c0_43, %c0_44] : memref<1x128xf32, #tpu.memory_space<vmem>>, vector<1x128xf32>
    %c0_45 = arith.constant 0 : index
    %c0_46 = arith.constant 0 : index
    %85 = vector.load %arg6[%c0_45, %c0_46] : memref<1x128xf32, #tpu.memory_space<vmem>>, vector<1x128xf32>
    %cst_47 = arith.constant dense<0.000000e+00> : vector<32x128xf32>
    %86 = tpu.matmul %83, %25, %cst_47 {dimension_numbers = #tpu.dot_dimension_numbers<[1], [0], [0], [1], [0, 0, 1, 1], [], []>} : vector<32x128xf32>, vector<128x128xf32>, vector<32x128xf32> -> vector<32x128xf32>
    %cst_48 = arith.constant dense<0.000000e+00> : vector<128xf32>
    %87 = vector.multi_reduction <add>, %86, %cst_48 [0] : vector<32x128xf32> to vector<128xf32>
    %88 = vector.shape_cast %87 : vector<128xf32> to vector<1x128xf32>
    %cst_49 = arith.constant 3.200000e+01 : f32
    %89 = vector.broadcast %cst_49 : f32 to vector<1x128xf32>
    %90 = arith.divf %88, %89 : vector<1x128xf32>
    %91 = arith.mulf %83, %83 : vector<32x128xf32>
    %cst_50 = arith.constant dense<0.000000e+00> : vector<32x128xf32>
    %92 = tpu.matmul %91, %25, %cst_50 {dimension_numbers = #tpu.dot_dimension_numbers<[1], [0], [0], [1], [0, 0, 1, 1], [], []>} : vector<32x128xf32>, vector<128x128xf32>, vector<32x128xf32> -> vector<32x128xf32>
    %cst_51 = arith.constant dense<0.000000e+00> : vector<128xf32>
    %93 = vector.multi_reduction <add>, %92, %cst_51 [0] : vector<32x128xf32> to vector<128xf32>
    %94 = vector.shape_cast %93 : vector<128xf32> to vector<1x128xf32>
    %cst_52 = arith.constant 3.200000e+01 : f32
    %95 = vector.broadcast %cst_52 : f32 to vector<1x128xf32>
    %96 = arith.divf %94, %95 : vector<1x128xf32>
    %97 = arith.mulf %90, %90 : vector<1x128xf32>
    %98 = arith.subf %96, %97 : vector<1x128xf32>
    %cst_53 = arith.constant 9.99999974E-6 : f32
    %99 = vector.broadcast %cst_53 : f32 to vector<1x128xf32>
    %100 = arith.addf %98, %99 : vector<1x128xf32>
    %101 = math.rsqrt %100 : vector<1x128xf32>
    %102 = arith.mulf %84, %101 : vector<1x128xf32>
    %103 = vector.broadcast %102 : vector<1x128xf32> to vector<32x128xf32>
    %104 = arith.mulf %83, %103 : vector<32x128xf32>
    %105 = arith.mulf %90, %102 : vector<1x128xf32>
    %106 = arith.subf %85, %105 : vector<1x128xf32>
    %107 = vector.broadcast %106 : vector<1x128xf32> to vector<32x128xf32>
    %108 = arith.addf %104, %107 : vector<32x128xf32>
    %109 = arith.addf %108, %26 : vector<32x128xf32>
    %cst_54 = arith.constant 0.000000e+00 : f32
    %110 = vector.broadcast %cst_54 : f32 to vector<32x128xf32>
    %111 = arith.maximumf %109, %110 : vector<32x128xf32>
    %c0_55 = arith.constant 0 : index
    %c0_56 = arith.constant 0 : index
    %112 = vector.load %arg8[%c0_55, %c0_56] : memref<32x128xf32, #tpu.memory_space<vmem>>, vector<32x128xf32>
    tpu.vector_store %arg8[%c0_55, %c0_56], %111 {strides = array<i32>} : memref<32x128xf32, #tpu.memory_space<vmem>>, vector<32x128xf32>,
    return
  }
}

</mosaic_0001>

<bundles_post_ra>
// kernel: tpu_custom_call.1
= control target key start
LH: loop header
LB: loop body
LE: loop exit
PB: predicated region body
PF: predicated region fallthrough
CT: control target
= control target key end

     0   :  { %13 = vsyncpa [#allocation4], 0  ;;  %s1775_s0 = inlined_call_operand.hbm [shape: f32[32,128], index: 0, kind: input, shape index: {}]   ;;  %s1776_s1 = inlined_call_operand.hbm [shape: bf16[384,128], index: 1, kind: input, shape index: {}]   ;;  %s1777_s2 = inlined_call_operand.hbm [shape: bf16[384,128], index: 2, kind: input, shape index: {}]   ;;  %s1778_s3 = inlined_call_operand.vmem [shape: f32[1,128], index: 3, kind: input, shape index: {}]   ;;  %s1779_s4 = inlined_call_operand.vmem [shape: f32[1,128], index: 4, kind: input, shape index: {}]   ;;  %s1780_s5 = inlined_call_operand.vmem [shape: f32[1,128], index: 5, kind: input, shape index: {}]   ;;  %s1781_s6 = inlined_call_operand.vmem [shape: f32[1,128], index: 6, kind: input, shape index: {}]   ;;  %s1782_s7 = inlined_call_operand.hbm [shape: f32[128,128], index: 7, kind: input, shape index: {}]   ;;  %s1783_s8 = inlined_call_operand.hbm [shape: f32[32,128], index: 8, kind: output, shape index: {}]  }
   0x1   :  { %14 = vsyncpa [#allocation7], 0 }
   0x2   :  { %15 = vsyncpa [#allocation10], 0  ;;  %s34_s29 = sshll.u32 %s1776_s1, 4  ;;  %s35_s29 = int_to_ptr.hbm [resolvable:$true] %s34_s29 }
   0x3   :  { %16 = vsyncpa [#allocation5], 0  ;;  %s1456_s30 = smov [#allocation6]   ;;  %s21_s12 = sshll.u32 %s1775_s0, 4  ;;  %s22_s12 = int_to_ptr.hbm [resolvable:$true] %s21_s12 }
   0x4   :  { %s36_s9 = sshll.u32 %s1456_s30, 4  ;;  %s1457_s13 = smov 64   ;;  %s37_s9 = int_to_ptr.vmem [resolvable:$true] %s36_s9 }
   0x5   :  { %s1458_s14 = smov 4   ;;  %s1459_s15 = smov [#allocation3]  }
   0x6   :  { %42 = dma.hbm_to_vmem [thread:$0]  %s35_s29, 3072, %s37_s9, [#allocation7], %s1457_s13, %s1457_s13, %s1458_s14  }
   0x7   :  { %s23_s16 = sshll.u32 %s1459_s15, 4  ;;  %s1460_s17 = smov 128   ;;  %s24_s16 = int_to_ptr.vmem [resolvable:$true] %s23_s16 }
   0x8   :  { %s1461_s18 = smov 8   ;;  %s47_s20 = sshll.u32 %s1777_s2, 4  ;;  %s48_s20 = int_to_ptr.hbm [resolvable:$true] %s47_s20 }
   0x9   :  { %29 = dma.hbm_to_vmem [thread:$0]  %s22_s12, 512, %s24_s16, [#allocation4], %s1460_s17, %s1460_s17, %s1461_s18  }
   0xa   :  { %s1462_s21 = smov [#allocation8]   ;;  %s68_s24 = sshll.u32 %s1782_s7, 4  ;;  %s69_s24 = int_to_ptr.hbm [resolvable:$true] %s68_s24 }
   0xb   :  { %s49_s0 = sshll.u32 %s1462_s21, 4  ;;  %s1463_s25 = smov [#allocation9]   ;;  %s50_s0 = int_to_ptr.vmem [resolvable:$true] %s49_s0 }
   0xc   :  { %55 = dma.hbm_to_vmem [thread:$0]  %s48_s20, 3072, %s50_s0, [#allocation7], %s1457_s13, %s1457_s13, %s1458_s14  }
   0xd   :  { %s70_s26 = sshll.u32 %s1463_s25, 4  ;;  %s71_s26 = int_to_ptr.vmem [resolvable:$true] %s70_s26 }
   0xe   :  { %76 = dma.hbm_to_vmem [thread:$0]  %s69_s24, 2048, %s71_s26, [#allocation10], %s1460_s17, %s1460_s17, %s1461_s18  }
   0xf   :  { %1448 = dma.done.wait [#allocation4], 512  }
  0x10   :  { %1449 = vsyncadd [#allocation4], 4294966784 }
  0x11   :  { %1450 = dma.done.wait [#allocation7], 6144  }
  0x12   :  { %1451 = vsyncadd [#allocation7], 4294961152 }
  0x13   :  { %1452 = dma.done.wait [#allocation10], 2048  }
  0x14   :  { %1453 = vsyncadd [#allocation10], 4294965248  ;;  %v1464_v0 = vmov 0.0   ;;  %v1237_v1 = vld [vmem:[#allocation6 + $0x38] sm:$0xff]  ;;  %v1236_v4 = vld [vmem:[#allocation6 + $0x30] sm:$0xff]  ;;  %v93_v17 = vlaneseq  ;;  %vm1465_vm2 = vmmov 1  }
  0x15   :  { %154 = vst [vmem:[#allocation2] sm:$0x1] %v1464_v0  ;;  %v1245_v2 = vld [vmem:[#allocation6 + $0x78] sm:$0xff]  ;;  %410 = vmatpush.bf16.msra.mxu0 %v1237_v1  ;;  %v1244_v5 = vld [vmem:[#allocation6 + $0x70] sm:$0xff]  ;;  %v1235_v7 = vld [vmem:[#allocation6 + $0x28] sm:$0xff]  ;;  %s999_s11 = sshll.u32 %s1783_s8, 4  ;;  %s1000_s11 = int_to_ptr.hbm [resolvable:$true] %s999_s11 }
  0x16   :  { %155 = vst [vmem:[#allocation2 + $0x21] sm:$0x1] %v1464_v0  ;;  %v1253_v3 = vld [vmem:[#allocation6 + $0xb8] sm:$0xff]  ;;  %429 = vmatpush.bf16.msra.mxu1 %v1245_v2  ;;  %v1252_v6 = vld [vmem:[#allocation6 + $0xb0] sm:$0xff]  ;;  %v1243_v8 = vld [vmem:[#allocation6 + $0x68] sm:$0xff]  ;;  %v94_v21 = vshrl.u32 %v93_v17, 7 }
  0x17   :  { %448 = vmatpush.bf16.msra.mxu2 %v1253_v3  ;;  %v1251_v9 = vld [vmem:[#allocation6 + $0xa8] sm:$0xff]  ;;  %v1531_v10 = vld [vmem:[#allocation3] sm:$0xff]  ;;  %v1536_v12 = vld [vmem:[#allocation3 + $0x10] sm:$0xff] }
  0x18   :  { %v1533_v11 = vld [vmem:[#allocation3 + $0x8] sm:$0xff]  ;;  %176 = vst [vmem:[#allocation2 + $0x1] sm:$0xff] %v1531_v10  ;;  %v1538_v13 = vld [vmem:[#allocation3 + $0x18] sm:$0xff]  ;;  %v1234_v14 = vld [vmem:[#allocation6 + $0x20] sm:$0xff]  ;;  %v95_v26 = vadd.s32 8, %v94_v21  ;;  %v102_v33 = vand.u32 15, %v94_v21 }
  0x19   :  { %411 = vmatpush.bf16.msra.mxu0 %v1236_v4  ;;  %v1242_v15 = vld [vmem:[#allocation6 + $0x60] sm:$0xff]  ;;  %177 = vst [vmem:[#allocation2 + $0x9] sm:$0xff] %v1533_v11  ;;  %v1233_v18 = vld [vmem:[#allocation6 + $0x18] sm:$0xff]  ;;  %v1232_v22 = vld [vmem:[#allocation6 + $0x10] sm:$0xff]  ;;  %v213_v45 = vpack.c.bf16 %v1533_v11, %v1531_v10  ;;  %v96_v52 = vadd.s32 16, %v94_v21  ;;  %v97_v53 = vadd.s32 24, %v94_v21  ;;  %v216_v63 = vpack.c.bf16 %v1538_v13, %v1536_v12 }
  0x1a   :  { %430 = vmatpush.bf16.msra.mxu1 %v1244_v5  ;;  %v1250_v16 = vld [vmem:[#allocation6 + $0xa0] sm:$0xff]  ;;  %178 = vst [vmem:[#allocation2 + $0x11] sm:$0xff] %v1536_v12  ;;  %v1241_v19 = vld [vmem:[#allocation6 + $0x58] sm:$0xff]  ;;  %v1240_v23 = vld [vmem:[#allocation6 + $0x50] sm:$0xff]  ;;  %v109_v34 = vand.u32 15, %v95_v26  ;;  %vm146_vm0 = vcmp.ge.s32.totalorder %v102_v33, 1 }
  0x1b   :  { %449 = vmatpush.bf16.msra.mxu2 %v1252_v6  ;;  %179 = vst [vmem:[#allocation2 + $0x19] sm:$0xff] %v1538_v13  ;;  %v1249_v20 = vld [vmem:[#allocation6 + $0x98] sm:$0xff]  ;;  %v1248_v25 = vld [vmem:[#allocation6 + $0x90] sm:$0xff]  ;;  %v1548_v28 = vld [vmem:[#allocation9 + $0x68] sm:$0xff]  ;;  %v116_v56 = vand.u32 15, %v96_v52  ;;  %v123_v57 = vand.u32 15, %v97_v53 }
  0x1c   :  { %v1543_v24 = vld [vmem:[#allocation9 + $0x78] sm:$0xff]  ;;  %v1546_v27 = vld [vmem:[#allocation9 + $0x70] sm:$0xff]  ;;  %v1231_v29 = vld [vmem:[#allocation6 + $0x8] sm:$0xff]  ;;  %vm151_vm1 = vcmp.le.s32.totalorder %v109_v34, 14  ;;  %v1466_v52 = vmov 32.0  }
  0x1d   :  { %412 = vmatpush.bf16.msra.mxu0 %v1235_v7  ;;  %469 = vmatpush.msra.mxu3 %v1543_v24  ;;  %v1239_v30 = vld [vmem:[#allocation6 + $0x48] sm:$0xff]  ;;  %v1551_v31 = vld [vmem:[#allocation9 + $0x60] sm:$0xff]  ;;  %v1554_v35 = vld [vmem:[#allocation9 + $0x58] sm:$0xff]  ;;  %vm148_vm5 = vcmp.ge.s32.totalorder %v116_v56, 1  ;;  %vm153_vm6 = vcmp.le.s32.totalorder %v123_v57, 14  ;;  %1322 = vrcp.f32 %v1466_v52 }
  0x1e   :  { %431 = vmatpush.bf16.msra.mxu1 %v1243_v8  ;;  %v1247_v32 = vld [vmem:[#allocation6 + $0x88] sm:$0xff]  ;;  %v1230_v36 = vld [vmem:[#allocation6] sm:$0xff]  ;;  %v1557_v40 = vld [vmem:[#allocation9 + $0x50] sm:$0xff] }
  0x1f   :  { %450 = vmatpush.bf16.msra.mxu2 %v1251_v9  ;;  %470 = vmatpush.msra.mxu3 %v1546_v27  ;;  %v1238_v37 = vld [vmem:[#allocation6 + $0x40] sm:$0xff]  ;;  %v180_v38 = vld [vmem:[#allocation2] sm:$0xff]  ;;  %v1563_v46 = vld [vmem:[#allocation9 + $0x48] sm:$0xff] }
  0x20   :  { %v181_v39 = vld [vmem:[#allocation2 + $0x8] sm:$0xff]  ;;  %vm1566_vm3 = vmpackc.low %vm1465_vm2, %vm146_vm0  ;;  %v1584_v51 = vld [vmem:[#allocation9 + $0x38] sm:$0xff] }
  0x21   :  { %413 = vmatpush.bf16.msra.mxu0 %v1234_v14  ;;  %471 = vmatpush.msra.mxu3 %v1548_v28  ;;  %v1246_v41 = vld [vmem:[#allocation6 + $0x80] sm:$0xff]  ;;  %v1111_v44 = vpack.c.bf16 %v181_v39, %v180_v38  ;;  %vm1571_vm4 = vmpackc.low %vm151_vm1, %vm1465_vm2  ;;  %v1588_v54 = vld [vmem:[#allocation9 + $0x30] sm:$0xff] }
  0x22   :  { %432 = vmatpush.bf16.msra.mxu1 %v1242_v15  ;;  %v196_v42 = vld [vmem:[#allocation2 + $0x2] sm:$0xff]  ;;  %v197_v43 = vld [vmem:[#allocation2 + $0xa] sm:$0xff]  ;;  %v183_v59 = vld [vmem:[#allocation2 + $0x18] sm:$0xff] }
  0x23   :  { %451 = vmatpush.bf16.msra.mxu2 %v1250_v16  ;;  %472 = vmatpush.msra.mxu3 %v1551_v31  ;;  %v1117_v48 = vpack.c.bf16 %v197_v43, %v196_v42  ;;  %v1577_v50 = vld [vmem:[#allocation9 + $0x40] sm:$0xff]  ;;  %v1592_v55 = vld [vmem:[#allocation9 + $0x28] sm:$0xff]  ;;  %v199_v61 = vld [vmem:[#allocation2 + $0x1a] sm:$0xff] }
  0x24   :  { %v182_v58 = vld [vmem:[#allocation2 + $0x10] sm:$0xff]  ;;  %vm1602_vm7 = vmpackc.low %vm1465_vm2, %vm148_vm5  ;;  %v1619_v3 = vld [vmem:[#allocation9 + $0x20] sm:$0xff] }
  0x25   :  { %414 = vmatpush.bf16.msra.mxu0 %v1233_v18  ;;  %473 = vmatpush.msra.mxu3 %v1554_v35  ;;  %v198_v60 = vld [vmem:[#allocation2 + $0x12] sm:$0xff]  ;;  %v1114_v62 = vpack.c.bf16 %v183_v59, %v182_v58  ;;  %vm1608_vm8 = vmpackc.low %vm153_vm6, %vm1465_vm2  ;;  %v1622_v4 = vld [vmem:[#allocation9 + $0x18] sm:$0xff]  ;;  %v1323_v59 = vpop.eup %1322 }
  0x26   :  { %433 = vmatpush.bf16.msra.mxu1 %v1241_v19  ;;  %v1120_v1 = vpack.c.bf16 %v199_v61, %v198_v60  ;;  %v1625_v5 = vld [vmem:[#allocation9 + $0x10] sm:$0xff]  ;;  %v1631_v6 = vld [vmem:[#allocation9 + $0x8] sm:$0xff]  ;;  %v1635_v7 = vld [vmem:[#allocation9] sm:$0xff]  ;;  %vm512_vm9 = vweird.f32 %v1323_v59 }
  0x27   :  { %452 = vmatpush.bf16.msra.mxu2 %v1249_v20  ;;  %474 = vmatpush.msra.mxu3 %v1557_v40  ;;  %v1269_v53 = vld [vmem:[#allocation8 + $0x78] sm:$0xff]  ;;  %v1268_v58 = vld [vmem:[#allocation8 + $0x70] sm:$0xff]  ;;  %v1258_v52 = vld [vmem:[#allocation8 + $0x20] sm:$0xff] }
  0x29   :  { %415 = vmatpush.bf16.msra.mxu0 %v1232_v22  ;;  %475 = vmatpush.msra.mxu3 %v1563_v46 }
  0x2a   :  { %434 = vmatpush.bf16.msra.mxu1 %v1240_v23 }
  0x2b   :  { %453 = vmatpush.bf16.msra.mxu2 %v1248_v25  ;;  %476 = vmatpush.msra.mxu3 %v1577_v50 }
  0x2d   :  { %416 = vmatpush.bf16.msra.mxu0 %v1231_v29  ;;  %477 = vmatpush.msra.mxu3 %v1584_v51 }
  0x2e   :  { %435 = vmatpush.bf16.msra.mxu1 %v1239_v30 }
  0x2f   :  { %454 = vmatpush.bf16.msra.mxu2 %v1247_v32  ;;  %478 = vmatpush.msra.mxu3 %v1588_v54 }
  0x31   :  { %417 = vmatpush.bf16.msra.mxu0 %v1230_v36  ;;  %479 = vmatpush.msra.mxu3 %v1592_v55 }
  0x32   :  { %436 = vmatpush.bf16.msra.mxu1 %v1238_v37 }
  0x33   :  { %455 = vmatpush.bf16.msra.mxu2 %v1246_v41  ;;  %480 = vmatpush.msra.mxu3 %v1619_v3 }
  0x34   :  { %1112 = vmatmul.msk.bf16.vlgmr.msra.gmra.mxu0 %vm1566_vm3, %v1111_v44 }
  0x35   :  { %519 = vmatpush.msrb.mxu0 %v1543_v24  ;;  %437 = vmatmul.bf16.vlgmr.msra.gmra.mxu1 %v213_v45 }
  0x36   :  { %1118 = vmatmul.msk.bf16.vlgmr.msra.gmra.mxu2 %vm1571_vm4, %v1117_v48  ;;  %481 = vmatpush.msra.mxu3 %v1622_v4 }
  0x37   :  { %520 = vmatpush.msrb.mxu0 %v1546_v27  ;;  %829 = vmatpush.bf16.msrb.mxu2 %v1269_v53  ;;  %v1264_v53 = vld [vmem:[#allocation8 + $0x50] sm:$0xff] }
  0x38   :  { %482 = vmatpush.msra.mxu3 %v1625_v5 }
  0x39   :  { %521 = vmatpush.msrb.mxu0 %v1548_v28 }
  0x3a   :  { %483 = vmatpush.msra.mxu3 %v1631_v6 }
  0x3b   :  { %522 = vmatpush.msrb.mxu0 %v1551_v31  ;;  %830 = vmatpush.bf16.msrb.mxu2 %v1268_v58 }
  0x3c   :  { %484 = vmatpush.msra.mxu3 %v1635_v7 }
  0x3d   :  { %523 = vmatpush.msrb.mxu0 %v1554_v35 }
  0x3f   :  { %524 = vmatpush.msrb.mxu0 %v1557_v40 }
  0x41   :  { %525 = vmatpush.msrb.mxu0 %v1563_v46 }
  0x43   :  { %526 = vmatpush.msrb.mxu0 %v1577_v50 }
  0x44   :  { %1115 = vmatmul.msk.bf16.gmra.mxu0 %vm1602_vm7, %v1114_v62 }
  0x45   :  { %527 = vmatpush.msrb.mxu0 %v1584_v51  ;;  %442 = vmatmul.bf16.gmra.mxu1 %v216_v63 }
  0x46   :  { %1121 = vmatmul.msk.bf16.gmra.mxu2 %vm1608_vm8, %v1120_v1  ;;  %v508_v1 = vmul.f32 32.0, %v1323_v59 }
  0x47   :  { %528 = vmatpush.msrb.mxu0 %v1588_v54 }
  0x49   :  { %529 = vmatpush.msrb.mxu0 %v1592_v55 }
  0x4b   :  { %530 = vmatpush.msrb.mxu0 %v1619_v3 }
  0x4d   :  { %531 = vmatpush.msrb.mxu0 %v1622_v4 }
  0x4f   :  { %532 = vmatpush.msrb.mxu0 %v1625_v5 }
  0x51   :  { %533 = vmatpush.msrb.mxu0 %v1631_v6 }
  0x53   :  { %534 = vmatpush.msrb.mxu0 %v1635_v7 }
  0x55   :  { %869 = vmatpush.msra.mxu0 %v1543_v24 }
  0x57   :  { %870 = vmatpush.msra.mxu0 %v1546_v27 }
  0x59   :  { %871 = vmatpush.msra.mxu0 %v1548_v28 }
  0x5b   :  { %872 = vmatpush.msra.mxu0 %v1551_v31 }
  0x5d   :  { %873 = vmatpush.msra.mxu0 %v1554_v35 }
  0x5f   :  { %874 = vmatpush.msra.mxu0 %v1557_v40 }
  0x61   :  { %875 = vmatpush.msra.mxu0 %v1563_v46 }
  0x63   :  { %876 = vmatpush.msra.mxu0 %v1577_v50 }
  0x65   :  { %877 = vmatpush.msra.mxu0 %v1584_v51 }
  0x67   :  { %878 = vmatpush.msra.mxu0 %v1588_v54 }
  0x69   :  { %879 = vmatpush.msra.mxu0 %v1592_v55 }
  0x6b   :  { %880 = vmatpush.msra.mxu0 %v1619_v3 }
  0x6d   :  { %881 = vmatpush.msra.mxu0 %v1622_v4 }
  0x6f   :  { %882 = vmatpush.msra.mxu0 %v1625_v5 }
  0x71   :  { %883 = vmatpush.msra.mxu0 %v1631_v6 }
  0x73   :  { %884 = vmatpush.msra.mxu0 %v1635_v7 }
  0xb1   :  { %v419_v8 = vpop.f32.mrf.mxu0 }
  0xb2   :  { %v438_v9 = vpop.f32.mrf.mxu1 }
  0xb3   :  { %v439_v14 = vadd.f32 %v438_v9, %v419_v8  ;;  %v1277_v8 = vld [vmem:[#allocation8 + $0xb8] sm:$0xff] }
  0xb4   :  { %v1261_v9 = vld [vmem:[#allocation8 + $0x38] sm:$0xff]  ;;  %848 = vmatpush.bf16.msrb.mxu3 %v1277_v8 }
  0xb5   :  { %810 = vmatpush.bf16.msrb.mxu1 %v1261_v9 }
  0xb9   :  { %v457_v15 = vpop.f32.mrf.mxu2  ;;  %v421_v17 = vpop.f32.mrf.mxu0 }
  0xba   :  { %v1654_v16 = vadd.f32 %v457_v15, %v439_v14  ;;  %v440_v18 = vpop.f32.mrf.mxu1  ;;  %v1267_v14 = vld [vmem:[#allocation8 + $0x68] sm:$0xff] }
  0xbb   :  { %v441_v20 = vadd.f32 %v440_v18, %v421_v17  ;;  %831 = vmatpush.bf16.msrb.mxu2 %v1267_v14  ;;  %v1272_v14 = vld [vmem:[#allocation8 + $0x90] sm:$0xff] }
  0xbc   :  { %485 = vmatmul.f32.vlgmr.msra.gmra.mxu3 %v1654_v16  ;;  %v515_v19 = vmul.f32 %v1654_v16, %v1654_v16 }
  0xbe   :  { %535 = vmatmul.f32.vlgmr.msrb.gmra.mxu0 %v515_v19 }
  0xc1   :  { %v459_v21 = vpop.f32.mrf.mxu2  ;;  %v424_v23 = vpop.f32.mrf.mxu0 }
  0xc2   :  { %v1660_v22 = vadd.f32 %v459_v21, %v441_v20  ;;  %v443_v25 = vpop.f32.mrf.mxu1  ;;  %v509_v21 = vsub.f32 1.0, %v508_v1 }
  0xc3   :  { %v444_v29 = vadd.f32 %v443_v25, %v424_v23  ;;  %v1276_v23 = vld [vmem:[#allocation8 + $0xb0] sm:$0xff] }
  0xc4   :  { %488 = vmatmul.f32.gmra.mxu3 %v1660_v22  ;;  %v516_v26 = vmul.f32 %v1660_v22, %v1660_v22  ;;  %v1260_v25 = vld [vmem:[#allocation8 + $0x30] sm:$0xff] }
  0xc5   :  { %849 = vmatpush.bf16.msrb.mxu3 %v1276_v23  ;;  %811 = vmatpush.bf16.msrb.mxu1 %v1260_v25  ;;  %v1254_v23 = vld [vmem:[#allocation8] sm:$0xff] }
  0xc6   :  { %538 = vmatmul.f32.gmra.mxu0 %v516_v26  ;;  %v1266_v26 = vld [vmem:[#allocation8 + $0x60] sm:$0xff] }
  0xc7   :  { %832 = vmatpush.bf16.msrb.mxu2 %v1266_v26 }
  0xc9   :  { %v462_v30 = vpop.f32.mrf.mxu2  ;;  %v426_v34 = vpop.f32.mrf.mxu0 }
  0xca   :  { %v1665_v32 = vadd.f32 %v462_v30, %v444_v29  ;;  %v445_v36 = vpop.f32.mrf.mxu1 }
  0xcb   :  { %v446_v37 = vadd.f32 %v445_v36, %v426_v34  ;;  %v510_v36 = vmul.f32 %v1323_v59, %v509_v21  ;;  %v1270_v21 = vld [vmem:[#allocation8 + $0x80] sm:$0xff] }
  0xcc   :  { %491 = vmatmul.f32.gmra.mxu3 %v1665_v32  ;;  %v517_v33 = vmul.f32 %v1665_v32, %v1665_v32 }
  0xce   :  { %541 = vmatmul.f32.gmra.mxu0 %v517_v33 }
  0xd1   :  { %v464_v38 = vpop.f32.mrf.mxu2 }
  0xd2   :  { %v1670_v39 = vadd.f32 %v464_v38, %v446_v37  ;;  %v1275_v37 = vld [vmem:[#allocation8 + $0xa8] sm:$0xff] }
  0xd3   :  { %v1259_v38 = vld [vmem:[#allocation8 + $0x28] sm:$0xff]  ;;  %850 = vmatpush.bf16.msrb.mxu3 %v1275_v37 }
  0xd4   :  { %494 = vmatmul.f32.gmra.mxu3 %v1670_v39  ;;  %v518_v41 = vmul.f32 %v1670_v39, %v1670_v39  ;;  %812 = vmatpush.bf16.msrb.mxu1 %v1259_v38 }
  0xd6   :  { %544 = vmatmul.f32.gmra.mxu0 %v518_v41  ;;  %v1265_v41 = vld [vmem:[#allocation8 + $0x58] sm:$0xff] }
  0xd7   :  { %833 = vmatpush.bf16.msrb.mxu2 %v1265_v41 }
  0xd8   :  { %813 = vmatpush.bf16.msrb.mxu1 %v1258_v52 }
  0xdb   :  { %834 = vmatpush.bf16.msrb.mxu2 %v1264_v53 }
 0x13b   :  { %v536_v42 = vpop.f32.mrf.mxu0 }
 0x13f   :  { %v486_v43 = vpop.f32.mrf.mxu3 }
 0x143   :  { %v539_v44 = vpop.f32.mrf.mxu0 }
 0x144   :  { %v548_v57 = vadd.f32 %v539_v44, %v536_v42 }
 0x147   :  { %v489_v45 = vpop.f32.mrf.mxu3 }
 0x148   :  { %v498_v62 = vadd.f32 %v489_v45, %v486_v43  ;;  %v511_v45 = vadd.f32 %v1323_v59, %v510_v36 }
 0x14b   :  { %v542_v48 = vpop.f32.mrf.mxu0 }
 0x14c   :  { %v549_v60 = vadd.f32 %v548_v57, %v542_v48  ;;  %v1274_v48 = vld [vmem:[#allocation8 + $0xa0] sm:$0xff] }
 0x14d   :  { %851 = vmatpush.bf16.msrb.mxu3 %v1274_v48 }
 0x14f   :  { %v492_v56 = vpop.f32.mrf.mxu3 }
 0x150   :  { %v499_v15 = vadd.f32 %v498_v62, %v492_v56  ;;  %v1257_v62 = vld [vmem:[#allocation8 + $0x18] sm:$0xff] }
 0x151   :  { %814 = vmatpush.bf16.msrb.mxu1 %v1257_v62 }
 0x153   :  { %v545_v61 = vpop.f32.mrf.mxu0 }
 0x154   :  { %v550_v63 = vadd.f32 %v549_v60, %v545_v61  ;;  %v1675_v60 = vsel %vm512_vm9, %v1323_v59, %v511_v45  ;;  %v1273_v61 = vld [vmem:[#allocation8 + $0x98] sm:$0xff]  ;;  %v1271_v59 = vld [vmem:[#allocation8 + $0x88] sm:$0xff] }
 0x155   :  { %852 = vmatpush.bf16.msrb.mxu3 %v1273_v61 }
 0x156   :  { %v551_v17 = vrot.slane %v550_v63, 4 }
 0x157   :  { %v495_v18 = vpop.f32.mrf.mxu3 }
 0x158   :  { %v552_v19 = vadd.f32 %v551_v17, %v550_v63  ;;  %v500_v20 = vadd.f32 %v499_v15, %v495_v18  ;;  %v1263_v63 = vld [vmem:[#allocation8 + $0x48] sm:$0xff]  ;;  %v1256_v15 = vld [vmem:[#allocation8 + $0x10] sm:$0xff]  ;;  %v1262_v17 = vld [vmem:[#allocation8 + $0x40] sm:$0xff] }
 0x159   :  { %835 = vmatpush.bf16.msrb.mxu2 %v1263_v63  ;;  %853 = vmatpush.bf16.msrb.mxu3 %v1272_v14 }
 0x15a   :  { %v553_v29 = vrot.slane %v552_v19, 2  ;;  %v501_v30 = vrot.slane %v500_v20, 4  ;;  %815 = vmatpush.bf16.msrb.mxu1 %v1256_v15 }
 0x15c   :  { %v554_v33 = vadd.f32 %v553_v29, %v552_v19  ;;  %v502_v34 = vadd.f32 %v501_v30, %v500_v20  ;;  %v1255_v20 = vld [vmem:[#allocation8 + $0x8] sm:$0xff] }
 0x15d   :  { %836 = vmatpush.bf16.msrb.mxu2 %v1262_v17  ;;  %854 = vmatpush.bf16.msrb.mxu3 %v1271_v59 }
 0x15e   :  { %v503_v42 = vrot.slane %v502_v34, 2  ;;  %v555_v43 = vrot.slane %v554_v33, 1  ;;  %816 = vmatpush.bf16.msrb.mxu1 %v1255_v20 }
 0x160   :  { %v504_v44 = vadd.f32 %v503_v42, %v502_v34  ;;  %v556_v57 = vadd.f32 %v555_v43, %v554_v33  ;;  %v468_v34 = vld [vmem:[%s1779_s4] sm:$0x1] }
 0x161   :  { %1278 = vmatpush.msra.mxu2 %v1543_v24  ;;  %855 = vmatpush.bf16.msrb.mxu3 %v1270_v21 }
 0x162   :  { %v505_v56 = vrot.slane %v504_v44, 1  ;;  %v557_v8 = vmul.f32 %v556_v57, %v1675_v60  ;;  %817 = vmatpush.bf16.msrb.mxu1 %v1254_v23 }
 0x163   :  { %1279 = vmatpush.msra.mxu2 %v1546_v27 }
 0x164   :  { %v506_v58 = vadd.f32 %v505_v56, %v504_v44 }
 0x165   :  { %1280 = vmatpush.msra.mxu2 %v1548_v28  ;;  %1294 = vmatpush.msra.mxu3 %v1543_v24 }
 0x166   :  { %v514_v1 = vmul.f32 %v1675_v60, %v506_v58  ;;  %912 = vmatpush.msra.mxu1 %v1543_v24  ;;  %v467_v24 = vld [vmem:[%s1778_s3] sm:$0x1] }
 0x167   :  { %1281 = vmatpush.msra.mxu2 %v1551_v31  ;;  %1295 = vmatpush.msra.mxu3 %v1546_v27 }
 0x168   :  { %v558_v9 = vmul.f32 %v514_v1, %v514_v1  ;;  %913 = vmatpush.msra.mxu1 %v1546_v27 }
 0x169   :  { %1282 = vmatpush.msra.mxu2 %v1554_v35  ;;  %1296 = vmatpush.msra.mxu3 %v1548_v28 }
 0x16a   :  { %v559_v18 = vsub.f32 %v557_v8, %v558_v9  ;;  %914 = vmatpush.msra.mxu1 %v1548_v28 }
 0x16b   :  { %1283 = vmatpush.msra.mxu2 %v1557_v40  ;;  %1297 = vmatpush.msra.mxu3 %v1551_v31 }
 0x16c   :  { %v560_v19 = vadd.f32 1e-05, %v559_v18  ;;  %915 = vmatpush.msra.mxu1 %v1551_v31 }
 0x16d   :  { %1284 = vmatpush.msra.mxu2 %v1563_v46  ;;  %1298 = vmatpush.msra.mxu3 %v1554_v35 }
 0x16e   :  { %1324 = vrsqrt.f32 %v560_v19  ;;  %vm567_vm11 = vweird.f32 %v560_v19  ;;  %916 = vmatpush.msra.mxu1 %v1554_v35 }
 0x16f   :  { %1285 = vmatpush.msra.mxu2 %v1577_v50  ;;  %1299 = vmatpush.msra.mxu3 %v1557_v40 }
 0x170   :  { %917 = vmatpush.msra.mxu1 %v1557_v40 }
 0x171   :  { %1286 = vmatpush.msra.mxu2 %v1584_v51  ;;  %1300 = vmatpush.msra.mxu3 %v1563_v46 }
 0x172   :  { %918 = vmatpush.msra.mxu1 %v1563_v46 }
 0x173   :  { %1287 = vmatpush.msra.mxu2 %v1588_v54  ;;  %1301 = vmatpush.msra.mxu3 %v1577_v50 }
 0x174   :  { %v1325_v25 = vpop.eup %1324  ;;  %919 = vmatpush.msra.mxu1 %v1577_v50 }
 0x175   :  { %v562_v26 = vmul.f32 %v1325_v25, %v560_v19  ;;  %vm568_vm10 = vweird.f32 %v1325_v25  ;;  %1288 = vmatpush.msra.mxu2 %v1592_v55  ;;  %1302 = vmatpush.msra.mxu3 %v1584_v51 }
 0x176   :  { %vm569_vm12 = vmor %vm567_vm11, %vm568_vm10  ;;  %920 = vmatpush.msra.mxu1 %v1584_v51 }
 0x177   :  { %v563_v29 = vmul.f32 %v1325_v25, %v562_v26  ;;  %1289 = vmatpush.msra.mxu2 %v1619_v3  ;;  %1303 = vmatpush.msra.mxu3 %v1588_v54 }
 0x178   :  { %921 = vmatpush.msra.mxu1 %v1588_v54 }
 0x179   :  { %v564_v30 = vmul.f32 0.5, %v563_v29  ;;  %1290 = vmatpush.msra.mxu2 %v1622_v4  ;;  %1304 = vmatpush.msra.mxu3 %v1592_v55 }
 0x17a   :  { %922 = vmatpush.msra.mxu1 %v1592_v55 }
 0x17b   :  { %v565_v33 = vsub.f32 1.5, %v564_v30  ;;  %1291 = vmatpush.msra.mxu2 %v1625_v5  ;;  %1305 = vmatpush.msra.mxu3 %v1619_v3 }
 0x17c   :  { %923 = vmatpush.msra.mxu1 %v1619_v3 }
 0x17d   :  { %v566_v27 = vmul.f32 %v1325_v25, %v565_v33  ;;  %1292 = vmatpush.msra.mxu2 %v1631_v6  ;;  %1306 = vmatpush.msra.mxu3 %v1622_v4 }
 0x17e   :  { %924 = vmatpush.msra.mxu1 %v1622_v4 }
 0x17f   :  { %v570_v28 = vsel %vm569_vm12, %v1325_v25, %v566_v27  ;;  %1293 = vmatpush.msra.mxu2 %v1635_v7  ;;  %1307 = vmatpush.msra.mxu3 %v1625_v5 }
 0x180   :  { %v571_v31 = vmul.f32 %v570_v28, %v467_v24  ;;  %925 = vmatpush.msra.mxu1 %v1625_v5 }
 0x181   :  { %1308 = vmatpush.msra.mxu3 %v1631_v6 }
 0x182   :  { %v573_v35 = vperm.slane %v571_v31, 0  ;;  %v579_v36 = vmul.f32 %v571_v31, %v514_v1  ;;  %926 = vmatpush.msra.mxu1 %v1631_v6 }
 0x183   :  { %1309 = vmatpush.msra.mxu3 %v1635_v7 }
 0x184   :  { %v580_v40 = vsub.f32 %v468_v34, %v579_v36  ;;  %v577_v37 = vmul.f32 %v573_v35, %v1665_v32  ;;  %v575_v46 = vmul.f32 %v573_v35, %v1654_v16  ;;  %v576_v41 = vmul.f32 %v573_v35, %v1660_v22  ;;  %927 = vmatpush.msra.mxu1 %v1635_v7 }
 0x185   :  { %v578_v42 = vmul.f32 %v573_v35, %v1670_v39 }
 0x186   :  { %v582_v38 = vperm.slane %v580_v40, 0 }
 0x188   :  { %v586_v50 = vadd.f32 %v582_v38, %v577_v37  ;;  %v584_v43 = vadd.f32 %v582_v38, %v575_v46  ;;  %v585_v32 = vadd.f32 %v582_v38, %v576_v41  ;;  %v587_v44 = vadd.f32 %v582_v38, %v578_v42 }
 0x18a   :  { %v590_v51 = vmax.f32 %v586_v50, 0.0  ;;  %v588_v16 = vmax.f32 %v584_v43, 0.0  ;;  %v589_v22 = vmax.f32 %v585_v32, 0.0  ;;  %v591_v39 = vmax.f32 %v587_v44, 0.0 }
 0x18c   :  { %594 = vst [vmem:[#allocation2 + $0x11] sm:$0xff] %v590_v51  ;;  %v613_v54 = vpack.c.bf16 %v589_v22, %v588_v16  ;;  %v616_v5 = vpack.c.bf16 %v591_v39, %v590_v51 }
 0x18d   :  { %592 = vst [vmem:[#allocation2 + $0x1] sm:$0xff] %v588_v16 }
 0x18e   :  { %593 = vst [vmem:[#allocation2 + $0x9] sm:$0xff] %v589_v22  ;;  %837 = vmatmul.bf16.vlgmr.msrb.gmra.mxu2 %v613_v54 }
 0x18f   :  { %595 = vst [vmem:[#allocation2 + $0x19] sm:$0xff] %v591_v39 }
 0x194   :  { %v596_v55 = vld [vmem:[#allocation2] sm:$0xff] }
 0x195   :  { %v597_v3 = vld [vmem:[#allocation2 + $0x8] sm:$0xff]  ;;  %v598_v53 = vld [vmem:[#allocation2 + $0x10] sm:$0xff] }
 0x196   :  { %v604_v45 = vld [vmem:[#allocation2 + $0x2] sm:$0xff]  ;;  %v605_v48 = vld [vmem:[#allocation2 + $0xa] sm:$0xff]  ;;  %v1219_v4 = vpack.c.bf16 %v597_v3, %v596_v55  ;;  %v599_v6 = vld [vmem:[#allocation2 + $0x18] sm:$0xff] }
 0x197   :  { %v1225_v52 = vpack.c.bf16 %v605_v48, %v604_v45  ;;  %v606_v56 = vld [vmem:[#allocation2 + $0x12] sm:$0xff]  ;;  %v607_v57 = vld [vmem:[#allocation2 + $0x1a] sm:$0xff]  ;;  %v1222_v58 = vpack.c.bf16 %v599_v6, %v598_v53 }
 0x198   :  { %1220 = vmatmul.msk.bf16.vlgmr.msrb.gmra.mxu1 %vm1566_vm3, %v1219_v4  ;;  %v1228_v7 = vpack.c.bf16 %v607_v57, %v606_v56 }
 0x199   :  { %1226 = vmatmul.msk.bf16.vlgmr.msrb.gmra.mxu3 %vm1571_vm4, %v1225_v52 }
 0x19e   :  { %842 = vmatmul.bf16.gmra.mxu2 %v616_v5 }
 0x1a8   :  { %1223 = vmatmul.msk.bf16.gmra.mxu1 %vm1602_vm7, %v1222_v58 }
 0x1a9   :  { %1229 = vmatmul.msk.bf16.gmra.mxu3 %vm1608_vm8, %v1228_v7 }
 0x211   :  { %v838_v61 = vpop.f32.mrf.mxu2 }
 0x215   :  { %v819_v47 = vpop.f32.mrf.mxu1 }
 0x216   :  { %v839_v62 = vadd.f32 %v838_v61, %v819_v47  ;;  %v867_v47 = vld [vmem:[%s1780_s5] sm:$0x1]  ;;  %s1467_s5 = smov [#allocation11]  }
 0x219   :  { %v840_v1 = vpop.f32.mrf.mxu2 }
 0x21c   :  { %v857_v63 = vpop.f32.mrf.mxu3 }
 0x21d   :  { %v1745_v49 = vadd.f32 %v857_v63, %v839_v62  ;;  %v821_v8 = vpop.f32.mrf.mxu1 }
 0x21e   :  { %v841_v14 = vadd.f32 %v840_v1, %v821_v8 }
 0x21f   :  { %v908_v9 = vmul.f32 %v1745_v49, %v1745_v49  ;;  %885 = vmatmul.f32.vlgmr.msra.gmra.mxu0 %v1745_v49 }
 0x221   :  { %928 = vmatmul.f32.vlgmr.msra.gmra.mxu1 %v908_v9  ;;  %v843_v18 = vpop.f32.mrf.mxu2 }
 0x224   :  { %v859_v0 = vpop.f32.mrf.mxu3 }
 0x225   :  { %v1750_v15 = vadd.f32 %v859_v0, %v841_v14  ;;  %v824_v2 = vpop.f32.mrf.mxu1 }
 0x226   :  { %v844_v19 = vadd.f32 %v843_v18, %v824_v2 }
 0x227   :  { %888 = vmatmul.f32.gmra.mxu0 %v1750_v15  ;;  %v909_v17 = vmul.f32 %v1750_v15, %v1750_v15 }
 0x229   :  { %931 = vmatmul.f32.gmra.mxu1 %v909_v17  ;;  %v845_v25 = vpop.f32.mrf.mxu2 }
 0x22c   :  { %v862_v59 = vpop.f32.mrf.mxu3 }
 0x22d   :  { %v863_v20 = vadd.f32 %v862_v59, %v844_v19  ;;  %v826_v23 = vpop.f32.mrf.mxu1 }
 0x22e   :  { %v846_v26 = vadd.f32 %v845_v25, %v826_v23 }
 0x22f   :  { %v910_v21 = vmul.f32 %v863_v20, %v863_v20  ;;  %891 = vmatmul.f32.vlgmr.msra.gmra.mxu2 %v863_v20 }
 0x231   :  { %934 = vmatmul.f32.vlgmr.msra.gmra.mxu3 %v910_v21 }
 0x234   :  { %v864_v29 = vpop.f32.mrf.mxu3 }
 0x235   :  { %v865_v30 = vadd.f32 %v864_v29, %v846_v26 }
 0x237   :  { %894 = vmatmul.f32.gmra.mxu2 %v865_v30  ;;  %v911_v33 = vmul.f32 %v865_v30, %v865_v30 }
 0x239   :  { %937 = vmatmul.f32.gmra.mxu3 %v911_v33 }
 0x29c   :  { %v886_v24 = vpop.f32.mrf.mxu0 }
 0x29e   :  { %v929_v27 = vpop.f32.mrf.mxu1 }
 0x2a4   :  { %v889_v31 = vpop.f32.mrf.mxu0 }
 0x2a5   :  { %v898_v36 = vadd.f32 %v889_v31, %v886_v24 }
 0x2a6   :  { %v932_v35 = vpop.f32.mrf.mxu1 }
 0x2a7   :  { %v941_v40 = vadd.f32 %v932_v35, %v929_v27 }
 0x2b2   :  { %v892_v28 = vpop.f32.mrf.mxu2 }
 0x2b3   :  { %v899_v37 = vadd.f32 %v898_v36, %v892_v28 }
 0x2b4   :  { %v935_v34 = vpop.f32.mrf.mxu3 }
 0x2b5   :  { %v942_v46 = vadd.f32 %v941_v40, %v935_v34 }
 0x2ba   :  { %v895_v38 = vpop.f32.mrf.mxu2 }
 0x2bb   :  { %v900_v41 = vadd.f32 %v899_v37, %v895_v38 }
 0x2bc   :  { %v938_v42 = vpop.f32.mrf.mxu3 }
 0x2bd   :  { %v901_v50 = vrot.slane %v900_v41, 4  ;;  %v943_v43 = vadd.f32 %v942_v46, %v938_v42 }
 0x2bf   :  { %v902_v32 = vadd.f32 %v901_v50, %v900_v41  ;;  %v944_v44 = vrot.slane %v943_v43, 4 }
 0x2c1   :  { %v903_v51 = vrot.slane %v902_v32, 2  ;;  %v945_v16 = vadd.f32 %v944_v44, %v943_v43 }
 0x2c3   :  { %v904_v22 = vadd.f32 %v903_v51, %v902_v32  ;;  %v946_v39 = vrot.slane %v945_v16, 2 }
 0x2c5   :  { %v905_v54 = vrot.slane %v904_v22, 1  ;;  %v947_v55 = vadd.f32 %v946_v39, %v945_v16 }
 0x2c7   :  { %v906_v3 = vadd.f32 %v905_v54, %v904_v22  ;;  %v948_v45 = vrot.slane %v947_v55, 1 }
 0x2c9   :  { %v907_v48 = vmul.f32 %v906_v3, %v1675_v60  ;;  %v949_v4 = vadd.f32 %v948_v45, %v947_v55 }
 0x2cb   :  { %v951_v52 = vmul.f32 %v907_v48, %v907_v48  ;;  %v950_v5 = vmul.f32 %v949_v4, %v1675_v60  ;;  %v868_v60 = vld [vmem:[%s1781_s6] sm:$0x1]  ;;  %s997_s6 = sshll.u32 %s1467_s5, 4  ;;  %s998_s6 = int_to_ptr.vmem [resolvable:$true] %s997_s6 }
 0x2cd   :  { %v952_v53 = vsub.f32 %v950_v5, %v951_v52 }
 0x2cf   :  { %v953_v6 = vadd.f32 1e-05, %v952_v53 }
 0x2d1   :  { %1326 = vrsqrt.f32 %v953_v6  ;;  %vm960_vm14 = vweird.f32 %v953_v6 }
 0x2d7   :  { %v1327_v56 = vpop.eup %1326 }
 0x2d8   :  { %v955_v57 = vmul.f32 %v1327_v56, %v953_v6  ;;  %vm961_vm13 = vweird.f32 %v1327_v56 }
 0x2d9   :  { %vm962_vm15 = vmor %vm960_vm14, %vm961_vm13 }
 0x2da   :  { %v956_v58 = vmul.f32 %v1327_v56, %v955_v57 }
 0x2dc   :  { %v957_v7 = vmul.f32 0.5, %v956_v58 }
 0x2de   :  { %v958_v61 = vsub.f32 1.5, %v957_v7 }
 0x2e0   :  { %v959_v62 = vmul.f32 %v1327_v56, %v958_v61 }
 0x2e2   :  { %v963_v63 = vsel %vm962_vm15, %v1327_v56, %v959_v62 }
 0x2e3   :  { %v964_v1 = vmul.f32 %v963_v63, %v867_v47 }
 0x2e5   :  { %v966_v8 = vperm.slane %v964_v1, 0  ;;  %v972_v9 = vmul.f32 %v964_v1, %v907_v48 }
 0x2e7   :  { %v973_v14 = vsub.f32 %v868_v60, %v972_v9  ;;  %v968_v0 = vmul.f32 %v966_v8, %v1745_v49  ;;  %v969_v2 = vmul.f32 %v966_v8, %v1750_v15  ;;  %v970_v17 = vmul.f32 %v966_v8, %v863_v20 }
 0x2e8   :  { %v971_v18 = vmul.f32 %v966_v8, %v865_v30 }
 0x2e9   :  { %v975_v19 = vperm.slane %v973_v14, 0 }
 0x2eb   :  { %v977_v59 = vadd.f32 %v975_v19, %v968_v0  ;;  %v978_v21 = vadd.f32 %v975_v19, %v969_v2  ;;  %v979_v23 = vadd.f32 %v975_v19, %v970_v17  ;;  %v980_v25 = vadd.f32 %v975_v19, %v971_v18 }
 0x2ed   :  { %v981_v26 = vadd.f32 %v977_v59, %v1531_v10  ;;  %v982_v29 = vadd.f32 %v978_v21, %v1533_v11  ;;  %v983_v33 = vadd.f32 %v979_v23, %v1536_v12  ;;  %v984_v24 = vadd.f32 %v980_v25, %v1538_v13 }
 0x2ef   :  { %v985_v27 = vmax.f32 %v981_v26, 0.0  ;;  %v986_v28 = vmax.f32 %v982_v29, 0.0  ;;  %v987_v49 = vmax.f32 %v983_v33, 0.0  ;;  %v988_v15 = vmax.f32 %v984_v24, 0.0 }
 0x2f1   :  { %989 = vst [vmem:[#allocation11] sm:$0xff] %v985_v27 }
 0x2f2   :  { %990 = vst [vmem:[#allocation11 + $0x8] sm:$0xff] %v986_v28 }
 0x2f3   :  { %991 = vst [vmem:[#allocation11 + $0x10] sm:$0xff] %v987_v49 }
 0x2f4   :  { %992 = vst [vmem:[#allocation11 + $0x18] sm:$0xff] %v988_v15 }
 0x2f5   :  { %1005 = dma.vmem_to_hbm [thread:$0]  %s998_s6, 512, %s1000_s11, [#allocation5], %s1460_s17, %s1460_s17, %s1461_s18  }
 0x2f6   :  { %1454 = dma.done.wait [#allocation5], 512  }
 0x2f7   :  { %1455 = vsyncadd [#allocation5], 4294966784 }
 0x2f8   :  { %1010 = vsyncpa [#allocation4], 1 }
 0x2f9   :  { %1011 = vsyncpa [#allocation7], 1 }
 0x2fa   :  { %1012 = vsyncpa [#allocation10], 1 }
 0x2fb   :  { %1013 = vsyncpa [#allocation5], 1 }

</bundles_post_ra>
